<compile_context>
chip_gen: v7x
topology: tpu7x:2x2x1
jax: 0.10.0
libtpu: 0.0.40
codegen_flags: <defaults>
</compile_context>

<pallas_src>
import functools

import jax
import jax.numpy as jnp
from jax import lax
from jax.experimental import pallas as pl
from jax.experimental.pallas import tpu as pltpu

_LANES = 128
_SUBLANES = 8
_MAX_TB = 2048  # 2 f32 output slabs x 2 buffers x 128 lanes @ 2048 rows ~ 8 MiB


def _round_up(x, m):
    return ((x + m - 1) // m) * m


def _actor_critic_kernel(obs_ref, w1_ref, b1_ref, wh_ref, bh_ref,
                         probs_ref, logp_ref, *, num_actions):
    # convert_obs_to_hidden: Linear + tanh. bf16 operands -> full-rate MXU path,
    # f32 accumulate; elementwise math kept in f32.
    x = obs_ref[...].astype(jnp.bfloat16)
    hidden = jnp.tanh(
        jnp.dot(x, w1_ref[...], preferred_element_type=jnp.float32) + b1_ref[...]
    )

    # Fused policy+value head: one [TB,H] x [H,head_pad] matmul.
    # Lanes [0, A) = policy logits, lane A = value, remaining lanes = zero pad.
    heads = (
        jnp.dot(hidden.astype(jnp.bfloat16), wh_ref[...],
                preferred_element_type=jnp.float32)
        + bh_ref[...]
    )

    # Masked, numerically-stable softmax / log-softmax over the first
    # `num_actions` lanes (pad lanes pushed to -1e30 so exp -> 0 exactly).
    col = lax.broadcasted_iota(jnp.int32, heads.shape, 1)
    valid = col < num_actions
    logits = jnp.where(valid, heads, -1e30)

    m = jnp.max(logits, axis=-1, keepdims=True)
    shifted = logits - m
    e = jnp.exp(shifted)                              # single exp, reused below
    sum_exp = jnp.sum(e, axis=-1, keepdims=True)
    # Exact reciprocal: it operates on a [TB,1] column (a handful of vregs), so
    # approx saves nothing but would break sum(probs)==1 / probs<->log_probs
    # consistency.
    inv = pl.reciprocal(sum_exp, approx=False)
    probs = e * inv
    log_probs = shifted - jnp.log(sum_exp)

    # Pack the value into pad lane `num_actions` of the log_probs slab so only
    # two lane-dense f32 slabs go back to HBM (kernel is write-bound).
    packed = jnp.where(col == num_actions, heads, log_probs)

    probs_ref[...] = probs
    logp_ref[...] = packed


def prepare_params(params):
    """One-time parameter prep: fuse policy+value heads, lane-pad, cast to bf16."""
    w1, b1, wp, bp, wv, bv = (params[k] for k in ("w1", "b1", "wp", "bp", "wv", "bv"))
    H, A = wp.shape
    head_w = jnp.concatenate([wp, wv], axis=1)          # [H, A+1]
    head_b = jnp.concatenate([bp, bv], axis=1)          # [1, A+1]
    head_pad = _round_up(A + 1, _LANES)
    # TODO(synk): when A % 128 == 0 the extra value lane costs a full 128-lane
    # pad; a separate VPU/XLU row-reduction for v would be cheaper in that case.
    head_w = jnp.pad(head_w, ((0, 0), (0, head_pad - (A + 1))))
    head_b = jnp.pad(head_b, ((0, 0), (0, head_pad - (A + 1))))
    return {
        "w1": w1.astype(jnp.bfloat16),
        "b1": b1.astype(jnp.float32),
        "head_w": head_w.astype(jnp.bfloat16),
        "head_b": head_b.astype(jnp.float32),
        "num_actions": int(A),
        "head_pad": int(head_pad),
    }


def model_forward(observation, prepared):
    """Equivalent of Model.forward: returns ((probs, log_probs), v)."""
    w1 = prepared["w1"]
    b1 = prepared["b1"]
    head_w = prepared["head_w"]
    head_b = prepared["head_b"]
    A = prepared["num_actions"]
    head_pad = prepared["head_pad"]
    B, obs_dim = observation.shape

    # Batch tiling: spread rows evenly over the fewest <= _MAX_TB-row tiles
    # (avoids tail-tile blowup), round to 8 sublanes. Pallas masks the partial
    # last block, so no wrapper-side pad / extra HBM copy of obs is needed.
    n_tiles = pl.cdiv(B, _MAX_TB)
    TB = _round_up(pl.cdiv(B, n_tiles), _SUBLANES)
    grid = (pl.cdiv(B, TB),)

    out_block = pl.BlockSpec((TB, head_pad), lambda i: (i, 0))
    resident = lambda arr: pl.BlockSpec(arr.shape, lambda i: (0, 0))

    probs_pad, logp_pad = pl.pallas_call(
        functools.partial(_actor_critic_kernel, num_actions=A),
        grid=grid,
        in_specs=[
            pl.BlockSpec((TB, obs_dim), lambda i: (i, 0)),  # obs tile (batch-blocked)
            resident(w1),
            resident(b1),
            resident(head_w),
            resident(head_b),
        ],
        out_specs=[out_block, out_block],
        out_shape=[
            jax.ShapeDtypeStruct((B, head_pad), jnp.float32),
            jax.ShapeDtypeStruct((B, head_pad), jnp.float32),
        ],
        compiler_params=pltpu.CompilerParams(
            dimension_semantics=("parallel",),
            vmem_limit_bytes=32 * 1024 * 1024,  # footprint is a few MiB; lifts v5e's 16 MiB default
        ),
    )(observation, w1, b1, head_w, head_b)

    probs = probs_pad[:, :A]
    log_probs = logp_pad[:, :A]
    v = logp_pad[:, A:A + 1]       # value packed in pad lane A of the logp slab
    return (probs, log_probs), v


def _reference_forward(observation, params):
    hidden = jnp.tanh(observation @ params["w1"] + params["b1"])
    logits = hidden @ params["wp"] + params["bp"]
    log_probs = jax.nn.log_softmax(logits, axis=-1)
    probs = jnp.exp(log_probs)
    v = hidden @ params["wv"] + params["bv"]
    return (probs, log_probs), v


def init_params(key, obs_dim, hidden_dim, num_actions):
    k1, k2, k3 = jax.random.split(key, 3)
    scale1 = 1.0 / jnp.sqrt(obs_dim)
    scale2 = 1.0 / jnp.sqrt(hidden_dim)
    return {
        "w1": jax.random.normal(k1, (obs_dim, hidden_dim), jnp.float32) * scale1,
        "b1": jnp.zeros((1, hidden_dim), jnp.float32),
        "wp": jax.random.normal(k2, (hidden_dim, num_actions), jnp.float32) * scale2,
        "bp": jnp.zeros((1, num_actions), jnp.float32),
        "wv": jax.random.normal(k3, (hidden_dim, 1), jnp.float32) * scale2,
        "bv": jnp.zeros((1, 1), jnp.float32),
    }


if __name__ == "__main__":
    B, OBS_DIM, HIDDEN, ACTIONS = 8, 16, 32, 8

    key = jax.random.PRNGKey(0)
    key_obs, key_params = jax.random.split(key)
    observation = jax.random.normal(key_obs, (B, OBS_DIM), jnp.float32)
    params = init_params(key_params, OBS_DIM, HIDDEN, ACTIONS)

    prepared = prepare_params(params)       # one-time head fusion / bf16 cast
    (probs, log_probs), v = model_forward(observation, prepared)
    jax.block_until_ready((probs, log_probs, v))

    (probs_ref, logp_ref), v_ref = _reference_forward(observation, params)
    # Matmuls run with bf16 operands (f32 accumulate) -> tolerances sized for bf16.
    assert probs.shape == (B, ACTIONS) and log_probs.shape == (B, ACTIONS)
    assert v.shape == (B, 1)
    assert jnp.allclose(probs, probs_ref, atol=1e-2), "probs mismatch"
    assert jnp.allclose(log_probs, logp_ref, atol=5e-2), "log_probs mismatch"
    assert jnp.allclose(v, v_ref, atol=5e-2), "value mismatch"
    # Exact reciprocal in-kernel -> normalization holds to f32 rounding.
    assert jnp.allclose(jnp.sum(probs, axis=-1), 1.0, atol=1e-3), "probs not normalized"

    print("KERNEL_OK")
</pallas_src>

<mosaic_0001>
module attributes {stable_mosaic.version = 11 : i64} {
  func.func @_actor_critic_kernel(%arg0: i32, %arg1: memref<8x16xf32, #tpu.memory_space<vmem>>, %arg2: memref<16x32xbf16, #tpu.memory_space<vmem>>, %arg3: memref<1x32xf32, #tpu.memory_space<vmem>>, %arg4: memref<32x128xbf16, #tpu.memory_space<vmem>>, %arg5: memref<1x128xf32, #tpu.memory_space<vmem>>, %arg6: memref<8x128xf32, #tpu.memory_space<vmem>>, %arg7: memref<8x128xf32, #tpu.memory_space<vmem>>) attributes {dimension_semantics = [#tpu.dimension_semantics<parallel>], iteration_bounds = array<i64: 1>, scalar_prefetch = 0 : i64, scratch_operands = 0 : i64, tpu.core_type = #tpu.core_type<tc>, window_params = [{transform_indices = @transform_0, window_bounds = array<i64: 8, 16>}, {pipeline_mode = #tpu.pipeline_mode<synchronous>, transform_indices = @transform_1, window_bounds = array<i64: 16, 32>}, {pipeline_mode = #tpu.pipeline_mode<synchronous>, transform_indices = @transform_2, window_bounds = array<i64: 1, 32>}, {pipeline_mode = #tpu.pipeline_mode<synchronous>, transform_indices = @transform_3, window_bounds = array<i64: 32, 128>}, {pipeline_mode = #tpu.pipeline_mode<synchronous>, transform_indices = @transform_4, window_bounds = array<i64: 1, 128>}, {transform_indices = @transform_5, window_bounds = array<i64: 8, 128>}, {transform_indices = @transform_6, window_bounds = array<i64: 8, 128>}]} {
    %c0 = arith.constant 0 : index
    %c0_0 = arith.constant 0 : index
    %0 = vector.load %arg1[%c0, %c0_0] : memref<8x16xf32, #tpu.memory_space<vmem>>, vector<8x16xf32>
    %1 = arith.truncf %0 : vector<8x16xf32> to vector<8x16xbf16>
    %c0_1 = arith.constant 0 : index
    %c0_2 = arith.constant 0 : index
    %2 = vector.load %arg2[%c0_1, %c0_2] : memref<16x32xbf16, #tpu.memory_space<vmem>>, vector<16x32xbf16>
    %cst = arith.constant dense<0.000000e+00> : vector<8x32xf32>
    %3 = tpu.matmul %1, %2, %cst {dimension_numbers = #tpu.dot_dimension_numbers<[1], [0], [0], [1], [0, 0, 1, 1], [], []>} : vector<8x16xbf16>, vector<16x32xbf16>, vector<8x32xf32> -> vector<8x32xf32>
    %c0_3 = arith.constant 0 : index
    %c0_4 = arith.constant 0 : index
    %4 = vector.load %arg3[%c0_3, %c0_4] : memref<1x32xf32, #tpu.memory_space<vmem>>, vector<1x32xf32>
    %5 = vector.broadcast %4 : vector<1x32xf32> to vector<8x32xf32>
    %6 = arith.addf %3, %5 : vector<8x32xf32>
    %7 = math.tanh %6 : vector<8x32xf32>
    %8 = arith.truncf %7 : vector<8x32xf32> to vector<8x32xbf16>
    %c0_5 = arith.constant 0 : index
    %c0_6 = arith.constant 0 : index
    %9 = vector.load %arg4[%c0_5, %c0_6] : memref<32x128xbf16, #tpu.memory_space<vmem>>, vector<32x128xbf16>
    %cst_7 = arith.constant dense<0.000000e+00> : vector<8x128xf32>
    %10 = tpu.matmul %8, %9, %cst_7 {dimension_numbers = #tpu.dot_dimension_numbers<[1], [0], [0], [1], [0, 0, 1, 1], [], []>} : vector<8x32xbf16>, vector<32x128xbf16>, vector<8x128xf32> -> vector<8x128xf32>
    %c0_8 = arith.constant 0 : index
    %c0_9 = arith.constant 0 : index
    %11 = vector.load %arg5[%c0_8, %c0_9] : memref<1x128xf32, #tpu.memory_space<vmem>>, vector<1x128xf32>
    %12 = vector.broadcast %11 : vector<1x128xf32> to vector<8x128xf32>
    %13 = arith.addf %10, %12 : vector<8x128xf32>
    %14 = tpu.iota {dimensions = array<i32: 1>} : vector<8x128xi32>
    %c8_i32 = arith.constant 8 : i32
    %15 = vector.broadcast %c8_i32 : i32 to vector<8x128xi32>
    %16 = arith.cmpi slt, %14, %15 : vector<8x128xi32>
    %cst_10 = arith.constant -1.000000e+30 : f32
    %17 = vector.broadcast %cst_10 : f32 to vector<8x128xf32>
    %18 = arith.select %16, %13, %17 : vector<8x128xi1>, vector<8x128xf32>
    %cst_11 = arith.constant dense<0xFF800000> : vector<8xf32>
    %19 = vector.multi_reduction <maximumf>, %18, %cst_11 [1] : vector<8x128xf32> to vector<8xf32>
    %20 = vector.shape_cast %19 : vector<8xf32> to vector<8x1xf32>
    %21 = vector.broadcast %20 : vector<8x1xf32> to vector<8x128xf32>
    %22 = arith.subf %18, %21 : vector<8x128xf32>
    %23 = math.exp %22 : vector<8x128xf32>
    %cst_12 = arith.constant dense<0.000000e+00> : vector<8xf32>
    %24 = vector.multi_reduction <add>, %23, %cst_12 [1] : vector<8x128xf32> to vector<8xf32>
    %25 = vector.shape_cast %24 : vector<8xf32> to vector<8x1xf32>
    %26 = tpu.reciprocal %25 : vector<8x1xf32> -> vector<8x1xf32>
    %27 = vector.broadcast %26 : vector<8x1xf32> to vector<8x128xf32>
    %28 = arith.mulf %23, %27 : vector<8x128xf32>
    %29 = math.log %25 : vector<8x1xf32>
    %30 = vector.broadcast %29 : vector<8x1xf32> to vector<8x128xf32>
    %31 = arith.subf %22, %30 : vector<8x128xf32>
    %c8_i32_13 = arith.constant 8 : i32
    %32 = vector.broadcast %c8_i32_13 : i32 to vector<8x128xi32>
    %33 = arith.cmpi eq, %14, %32 : vector<8x128xi32>
    %34 = arith.select %33, %13, %31 : vector<8x128xi1>, vector<8x128xf32>
    %c0_14 = arith.constant 0 : index
    %c0_15 = arith.constant 0 : index
    %35 = vector.load %arg6[%c0_14, %c0_15] : memref<8x128xf32, #tpu.memory_space<vmem>>, vector<8x128xf32>
    tpu.vector_store %arg6[%c0_14, %c0_15], %28 {strides = array<i32>} : memref<8x128xf32, #tpu.memory_space<vmem>>, vector<8x128xf32>,
    %c0_16 = arith.constant 0 : index
    %c0_17 = arith.constant 0 : index
    %36 = vector.load %arg7[%c0_16, %c0_17] : memref<8x128xf32, #tpu.memory_space<vmem>>, vector<8x128xf32>
    tpu.vector_store %arg7[%c0_16, %c0_17], %34 {strides = array<i32>} : memref<8x128xf32, #tpu.memory_space<vmem>>, vector<8x128xf32>,
    return
  }
  func.func @transform_0(%arg0: i32) -> (i32, i32) {
    %c0_i32 = arith.constant 0 : i32
    %c0_i32_0 = arith.constant 0 : i32
    return %arg0, %c0_i32 : i32, i32
  }
  func.func @transform_1(%arg0: i32) -> (i32, i32) {
    %c0_i32 = arith.constant 0 : i32
    %c0_i32_0 = arith.constant 0 : i32
    %c0_i32_1 = arith.constant 0 : i32
    return %c0_i32, %c0_i32_0 : i32, i32
  }
  func.func @transform_2(%arg0: i32) -> (i32, i32) {
    %c0_i32 = arith.constant 0 : i32
    %c0_i32_0 = arith.constant 0 : i32
    %c0_i32_1 = arith.constant 0 : i32
    return %c0_i32, %c0_i32_0 : i32, i32
  }
  func.func @transform_3(%arg0: i32) -> (i32, i32) {
    %c0_i32 = arith.constant 0 : i32
    %c0_i32_0 = arith.constant 0 : i32
    %c0_i32_1 = arith.constant 0 : i32
    return %c0_i32, %c0_i32_0 : i32, i32
  }
  func.func @transform_4(%arg0: i32) -> (i32, i32) {
    %c0_i32 = arith.constant 0 : i32
    %c0_i32_0 = arith.constant 0 : i32
    %c0_i32_1 = arith.constant 0 : i32
    return %c0_i32, %c0_i32_0 : i32, i32
  }
  func.func @transform_5(%arg0: i32) -> (i32, i32) {
    %c0_i32 = arith.constant 0 : i32
    %c0_i32_0 = arith.constant 0 : i32
    return %arg0, %c0_i32 : i32, i32
  }
  func.func @transform_6(%arg0: i32) -> (i32, i32) {
    %c0_i32 = arith.constant 0 : i32
    %c0_i32_0 = arith.constant 0 : i32
    return %arg0, %c0_i32 : i32, i32
  }
}

</mosaic_0001>

<bundles_post_ra>
// kernel: tpu_custom_call.1
= control target key start
LH: loop header
LB: loop body
LE: loop exit
PB: predicated region body
PF: predicated region fallthrough
CT: control target
= control target key end

     0   :  { %12 = vsyncpa [#allocation3], 0  ;;  %s525_s0 = inlined_call_operand.hbm [shape: f32[8,16], index: 0, kind: input, shape index: {}]   ;;  %s526_s1 = inlined_call_operand.hbm [shape: bf16[16,32], index: 1, kind: input, shape index: {}]   ;;  %s527_s2 = inlined_call_operand.vmem [shape: f32[1,32], index: 2, kind: input, shape index: {}]   ;;  %s528_s3 = inlined_call_operand.hbm [shape: bf16[32,128], index: 3, kind: input, shape index: {}]   ;;  %s529_s4 = inlined_call_operand.vmem [shape: f32[1,128], index: 4, kind: input, shape index: {}]   ;;  %s530_s5 = inlined_call_operand.hbm [shape: f32[8,128], index: 5, kind: output, shape index: {0}]   ;;  %s531_s6 = inlined_call_operand.hbm [shape: f32[8,128], index: 6, kind: output, shape index: {1}]  }
   0x1   :  { %13 = vsyncpa [#allocation6], 0 }
   0x2   :  { %14 = vsyncpa [#allocation4], 0 }
   0x3   :  { %15 = vsyncpa [#allocation10], 0  ;;  %s408_s21 = smov [#allocation5]   ;;  %s290_s25 = scalar_lea.hbm %s526_s1, 128 }
   0x4   :  { %s31_s22 = sshll.u32 %s408_s21, 4  ;;  %p291_p0 = scmp.ne.s32.totalorder %s526_s1, %s290_s25  ;;  %s32_s22 = int_to_ptr.vmem [resolvable:$true] %s31_s22 }
   0x5   :  { %p294_p1 = scmp.lt.u32.totalorder %s290_s25, %s526_s1 }
   0x7   :  { %p296_p2 = pnand %p294_p1, %p291_p0 }
   0x9   :  { %299 = shalt.err (!%p296_p2)
}
   0xa   :  { %s300_s30 = scalar_lea.vmem %s32_s22, 128  ;;  %p305_p4 = scmp.lt.s32.totalorder %s32_s22, %s32_s22 }
   0xb   :  { %p301_p3 = scmp.ne.s32.totalorder %s32_s22, %s300_s30  ;;  %p306_p5 = scmp.lt.s32.totalorder %s300_s30, %s300_s30 }
   0xd   :  { %p307_p6 = por %p306_p5, %p305_p4 }
   0xf   :  { %p308_p7 = pnand %p307_p6, %p301_p3 }
  0x11   :  { %311 = shalt.err (!%p308_p7)
}
  0x12   :  { %s409_s7 = smov 64   ;;  %s410_s8 = smov 4  }
  0x13   :  { %37 = dma.hbm_to_vmem [thread:$0]  %s526_s1, 128, %s32_s22, [#allocation6], %s409_s7, %s409_s7, %s410_s8  }
  0x14   :  { %s411_s11 = smov [#allocation2]   ;;  %s412_s13 = smov [#allocation7]  }
  0x15   :  { %s22_s12 = sshll.u32 %s411_s11, 4  ;;  %s45_s14 = sshll.u32 %s412_s13, 4  ;;  %s23_s12 = int_to_ptr.vmem [resolvable:$true] %s22_s12  ;;  %s46_s14 = int_to_ptr.vmem [resolvable:$true] %s45_s14 }
  0x16   :  { %s312_s17 = scalar_lea.hbm %s525_s0, 128 }
  0x17   :  { %p313_p8 = scmp.ne.s32.totalorder %s525_s0, %s312_s17  ;;  %p316_p9 = scmp.lt.u32.totalorder %s312_s17, %s525_s0 }
  0x19   :  { %p318_p10 = pnand %p316_p9, %p313_p8 }
  0x1b   :  { %321 = shalt.err (!%p318_p10)
}
  0x1c   :  { %s322_s1 = scalar_lea.vmem %s23_s12, 128  ;;  %p327_p12 = scmp.lt.s32.totalorder %s23_s12, %s23_s12 }
  0x1d   :  { %p323_p11 = scmp.ne.s32.totalorder %s23_s12, %s322_s1  ;;  %p328_p13 = scmp.lt.s32.totalorder %s322_s1, %s322_s1 }
  0x1f   :  { %p329_p0 = por %p328_p13, %p327_p12 }
  0x21   :  { %p330_p1 = pnand %p329_p0, %p323_p11 }
  0x23   :  { %333 = shalt.err (!%p330_p1)
}
  0x24   :  { %25 = dma.hbm_to_vmem [thread:$0]  %s525_s0, 128, %s23_s12, [#allocation3]  }
  0x25   :  { %s334_s26 = scalar_lea.hbm %s528_s3, 256 }
  0x26   :  { %p335_p2 = scmp.ne.s32.totalorder %s528_s3, %s334_s26  ;;  %p338_p3 = scmp.lt.u32.totalorder %s334_s26, %s528_s3 }
  0x28   :  { %p340_p4 = pnand %p338_p3, %p335_p2 }
  0x2a   :  { %343 = shalt.err (!%p340_p4)
}
  0x2b   :  { %s344_s9 = scalar_lea.vmem %s46_s14, 256  ;;  %p349_p6 = scmp.lt.s32.totalorder %s46_s14, %s46_s14 }
  0x2c   :  { %p345_p5 = scmp.ne.s32.totalorder %s46_s14, %s344_s9  ;;  %p350_p7 = scmp.lt.s32.totalorder %s344_s9, %s344_s9 }
  0x2e   :  { %p351_p8 = por %p350_p7, %p349_p6 }
  0x30   :  { %p352_p9 = pnand %p351_p8, %p345_p5 }
  0x32   :  { %355 = shalt.err (!%p352_p9)
}
  0x33   :  { %51 = dma.hbm_to_vmem [thread:$0]  %s528_s3, 256, %s46_s14, [#allocation6], %s409_s7, %s409_s7, %s410_s8  }
  0x34   :  { %400 = dma.done.wait [#allocation3], 128  }
  0x35   :  { %401 = vsyncadd [#allocation3], 4294967168 }
  0x36   :  { %402 = dma.done.wait [#allocation6], 384  }
  0x37   :  { %403 = vsyncadd [#allocation6], 4294966912  ;;  %v413_v0 = vmov 0.0   ;;  %vm414_vm0 = vmmov 0   ;;  %v279_v1 = vld [vmem:[#allocation5] sm:$0xff]   ;;  %v64_v2 = vld [vmem:[#allocation2] sm:$0xff]  ;;  %v194_v14 = vlaneseq }
  0x38   :  { %256 = vmatprep.subr.bf16.mxu0 %v413_v0  ;;  %258 = vmatprep.mubr.msk.bf16.mxu0 %vm414_vm0, %v413_v0  ;;  %vm81_vm1 = vcmask 130048   ;;  %v65_v3 = vpack.c.bf16 %v64_v2, %v64_v2  ;;  %v280_v4 = vld [vmem:[#allocation7] sm:$0xff]   ;;  %v281_v5 = vld [vmem:[#allocation7 + $0x8] sm:$0xff]   ;;  %v244_v6 = vld [vmem:[%s527_s2] ss:$0 sm:$0xff]  ;;  %vm150_vm2 = vcmask 261120  }
  0x39   :  { %262 = vmatprep.subr.bf16.mxu1 %v413_v0  ;;  %266 = vmatprep.mubr.msk.bf16.mxu1 %vm414_vm0, %v413_v0  ;;  %v195_v15 = vand.u32 127, %v194_v14  ;;  %v247_v16 = vld [vmem:[%s529_s4] ss:$0 sm:$0xff]  ;;  %s415_s2 = smov [#allocation8]   ;;  %s416_s4 = smov [#allocation9]  }
  0x3a   :  { %257 = vmatpush3.bf16.msra.mxu0 %v279_v1  ;;  %263 = vmatpush3.bf16.msra.mxu1 %v280_v4  ;;  %s220_s12 = sshll.u32 %s415_s2, 4  ;;  %s230_s13 = sshll.u32 %s416_s4, 4  ;;  %s221_s12 = int_to_ptr.vmem [resolvable:$true] %s220_s12  ;;  %s231_s13 = int_to_ptr.vmem [resolvable:$true] %s230_s13 }
  0x3b   :  { %264 = vmatprep.subr.bf16.mxu1 %v413_v0  ;;  %vm196_vm3 = vcmp.lt.s32.totalorder %v195_v15, 8  ;;  %vm210_vm4 = vcmp.eq.s32.totalorder %v195_v15, 8  ;;  %s356_s14 = scalar_lea.vmem %s221_s12, 128  ;;  %p361_p11 = scmp.lt.s32.totalorder %s221_s12, %s221_s12 }
  0x3c   :  { %p357_p10 = scmp.ne.s32.totalorder %s221_s12, %s356_s14  ;;  %p362_p12 = scmp.lt.s32.totalorder %s356_s14, %s356_s14 }
  0x3d   :  { %259 = vmatmul.mubr.msk.bf16.vlgmr.msra.gmra.mrb[0].mxu0 %vm81_vm1, %v65_v3 }
  0x3e   :  { %265 = vmatpush3.bf16.msra.mxu1 %v281_v5  ;;  %p363_p13 = por %p362_p12, %p361_p11 }
  0x40   :  { %p364_p0 = pnand %p363_p13, %p357_p10 }
 0x110   :  { %v119_v7 = vpop.f32.mrb[0].mxu0 }
 0x111   :  { %v120_v8 = vadd.f32 %v244_v6, %v119_v7  ;;  %v260_v9 = vpop.f32.mrb[1].mxu0 }
 0x112   :  { %v122_v10 = vpop.f32.mrb[2].mxu0 }
 0x113   :  { %282 = vtanh.f32 %v120_v8  ;;  %v261_v11 = vpop.f32.mrb[3].mxu0 }
 0x11d   :  { %v283_v12 = vpop.eup %282 }
 0x11e   :  { %v126_v13 = vpack.c.bf16 %v283_v12, %v283_v12 }
 0x120   :  { %267 = vmatmul.mubr.msk.bf16.vlgmr.msra.gmra.mrb[0].mxu1 %vm150_vm2, %v126_v13 }
 0x1f3   :  { %v188_v17 = vpop.f32.mrb[0].mxu1 }
 0x1f4   :  { %v189_v18 = vadd.f32 %v247_v16, %v188_v17  ;;  %v268_v19 = vpop.f32.mrb[1].mxu1 }
 0x1f5   :  { %v191_v20 = vpop.f32.mrb[2].mxu1 }
 0x1f6   :  { %v269_v21 = vpop.f32.mrb[3].mxu1  ;;  %v197_v22 = vsel %vm196_vm3, %v189_v18, -1e+30 }
 0x1f7   :  { %198 = vmax.xlane.f32.xlu0 %v197_v22 }
 0x284   :  { %v199_v23 = vpop.xlane.xlu0 %198 }
 0x285   :  { %v200_v24 = vsub.f32 %v197_v22, %v199_v23 }
 0x287   :  { %v201_v25 = vmul.f32 1.442695, %v200_v24 }
 0x289   :  { %284 = vpow2.f32 %v201_v25 }
 0x293   :  { %v285_v26 = vpop.eup %284 }
 0x294   :  { %203 = vadd.xlane.f32.xlu0 %v285_v26 }
 0x321   :  { %v204_v27 = vpop.xlane.xlu0 %203 }
 0x322   :  { %286 = vrcp.f32 %v204_v27 }
 0x323   :  { %288 = vlog2.f32 %v204_v27 }
 0x32c   :  { %v287_v28 = vpop.eup %286 }
 0x32d   :  { %v289_v29 = vpop.eup %288  ;;  %v206_v30 = vmul.f32 %v287_v28, %v285_v26 }
 0x32e   :  { %v208_v31 = vmul.f32 0.6931472, %v289_v29 }
 0x32f   :  { %212 = vst [vmem:[#allocation8] sm:$0xff] %v206_v30 }
 0x330   :  { %v209_v32 = vsub.f32 %v200_v24, %v208_v31 }
 0x331   :  { %367 = shalt.err (!%p364_p0)
}
 0x332   :  { %s368_s17 = scalar_lea.hbm %s530_s5, 128 }
 0x333   :  { %p369_p1 = scmp.ne.s32.totalorder %s530_s5, %s368_s17  ;;  %p372_p2 = scmp.lt.u32.totalorder %s368_s17, %s530_s5 }
 0x335   :  { %p374_p3 = pnand %p372_p2, %p369_p1 }
 0x337   :  { %377 = shalt.err (!%p374_p3)
}
 0x338   :  { %223 = dma.vmem_to_hbm [thread:$0]  %s221_s12, 128, %s530_s5, [#allocation4]   ;;  %v211_v33 = vsel %vm210_vm4, %v189_v18, %v209_v32 }
 0x339   :  { %213 = vst [vmem:[#allocation9] sm:$0xff] %v211_v33  ;;  %s378_s23 = scalar_lea.vmem %s231_s13, 128  ;;  %p383_p5 = scmp.lt.s32.totalorder %s231_s13, %s231_s13 }
 0x33a   :  { %p379_p4 = scmp.ne.s32.totalorder %s231_s13, %s378_s23  ;;  %p384_p6 = scmp.lt.s32.totalorder %s378_s23, %s378_s23 }
 0x33c   :  { %p385_p7 = por %p384_p6, %p383_p5 }
 0x33e   :  { %p386_p8 = pnand %p385_p7, %p379_p4 }
 0x340   :  { %389 = shalt.err (!%p386_p8)
}
 0x341   :  { %s390_s26 = scalar_lea.hbm %s531_s6, 128 }
 0x342   :  { %p391_p9 = scmp.ne.s32.totalorder %s531_s6, %s390_s26  ;;  %p394_p10 = scmp.lt.u32.totalorder %s390_s26, %s531_s6 }
 0x344   :  { %p396_p11 = pnand %p394_p10, %p391_p9 }
 0x346   :  { %399 = shalt.err (!%p396_p11)
}
 0x347   :  { %233 = dma.vmem_to_hbm [thread:$0]  %s231_s13, 128, %s531_s6, [#allocation10]  }
 0x348   :  { %404 = dma.done.wait [#allocation4], 128  }
 0x349   :  { %405 = vsyncadd [#allocation4], 4294967168 }
 0x34a   :  { %406 = dma.done.wait [#allocation10], 128  }
 0x34b   :  { %407 = vsyncadd [#allocation10], 4294967168 }
 0x34c   :  { %240 = vsyncpa [#allocation3], 1 }
 0x34d   :  { %241 = vsyncpa [#allocation6], 1 }
 0x34e   :  { %242 = vsyncpa [#allocation4], 1 }
 0x34f   :  { %243 = vsyncpa [#allocation10], 1 }

</bundles_post_ra>
